<compile_context>
chip_gen: v5e
topology: v5e:2x2
jax: 0.10.0
libtpu: 0.0.40
codegen_flags: <defaults>
</compile_context>

<pallas_src>
import functools

import jax
import jax.numpy as jnp
from jax.experimental import pallas as pl
from jax.experimental.pallas import tpu as pltpu


def _round_up(x: int, m: int) -> int:
    return ((x + m - 1) // m) * m


def _mlp_fused_kernel(x_ref, w_ref, b_ref, o_ref, h_ref, *,
                      num_linear: int, dout_pad: int):
    """One (batch_tile, layer) grid step.

    x_ref: [tm, Dmax]    f32 input tile (padded), resident across the layer axis
    w_ref: [Dmax, Dmax]  bf16 weight of this layer, streamed per layer
    b_ref: [1, Dmax]     f32 bias of this layer, streamed per layer
    o_ref: [tm, Dpad_out] f32 output tile (written only on the last layer)
    h_ref: [tm, Dmax]    f32 VMEM scratch: running activation
    """
    layer = pl.program_id(1)
    last = num_linear - 1

    # Load the input tile into the resident activation buffer once per tile.
    @pl.when(layer == 0)
    def _():
        h_ref[...] = x_ref[...]

    # MXU matmul: bf16 operands, f32 accumulation; bias added in f32.
    y = jnp.dot(h_ref[...].astype(jnp.bfloat16), w_ref[...],
                preferred_element_type=jnp.float32)
    y = y + b_ref[...]  # [1, Dmax] broadcast over the batch tile

    # ReLU + keep going for every Linear except the final one.
    @pl.when(layer < last)
    def _():
        h_ref[...] = jnp.maximum(y, 0.0)

    # Final Linear: write only the (lane-dense) true-output columns.
    @pl.when(layer == last)
    def _():
        o_ref[...] = y[:, :dout_pad].astype(o_ref.dtype)


def _vmem_budget_and_cores():
    """Per-generation VMEM budget (bytes) and TensorCore count heuristic."""
    kind = ""
    try:
        kind = jax.devices()[0].device_kind.lower()
    except Exception:
        pass
    if "v7" in kind:
        return 48 * 1024 * 1024, 2   # v7x: 64 MiB physical / TC, 2 TCs
    return 100 * 1024 * 1024, 1      # v5e / v6e: 128 MiB physical, 1 TC


def _choose_tm(B, dmax, dout_pad, vmem_budget, num_cores):
    """Largest batch tile (multiple of 8) that fits the VMEM budget."""
    def vmem_use(t):
        return (2 * t * dmax * 4          # double-buffered f32 input tile
                + 2 * dmax * dmax * 2     # double-buffered bf16 weight
                + 2 * dmax * 4            # double-buffered f32 bias
                + 2 * t * dout_pad * 4    # double-buffered f32 output tile
                + t * dmax * 4)           # f32 activation scratch
    cap = 1024
    while cap > 8 and vmem_use(cap) > vmem_budget:
        cap //= 2
    tm = min(_round_up(B, 8), max(cap, 8))
    if num_cores > 1 and B >= 16:
        # Ensure >= 2 batch tiles so the "parallel" axis spans both TCs.
        tm = min(tm, _round_up((B + 1) // 2, 8))
    return max(tm, 8)


def prepare_mlp_params(params):
    """One-time packing of weights/biases (hoisted out of the forward pass).

    params: list of (W [din, dout], b [dout]) tuples (W transposed vs
            PyTorch's nn.Linear weight), ReLU between all but the last pair.
    """
    L = len(params)
    dims = [params[0][0].shape[0]] + [w.shape[1] for (w, _) in params]
    dmax = _round_up(max(dims + [128]), 128)
    dout_true = params[-1][0].shape[1]
    dout_pad = _round_up(dout_true, 128)

    ws = jnp.stack([
        jnp.pad(w.astype(jnp.bfloat16),
                ((0, dmax - w.shape[0]), (0, dmax - w.shape[1])))
        for (w, _) in params])                      # [L, Dmax, Dmax] bf16
    bs = jnp.stack([
        jnp.pad(b.astype(jnp.float32), (0, dmax - b.shape[0]))[None, :]
        for (_, b) in params])                      # [L, 1, Dmax] f32

    return {"ws": ws, "bs": bs, "L": L, "dmax": dmax,
            "dout_true": dout_true, "dout_pad": dout_pad}


def mlp_forward_fused(prepared, x):
    """Fused MLP forward: x @ W0 + b0 -> ReLU -> ... -> x @ W_last + b_last."""
    ws, bs = prepared["ws"], prepared["bs"]
    L, dmax = prepared["L"], prepared["dmax"]
    dout_true, dout_pad = prepared["dout_true"], prepared["dout_pad"]

    B, din = x.shape
    vmem_budget, ncores = _vmem_budget_and_cores()
    tm = _choose_tm(B, dmax, dout_pad, vmem_budget, ncores)
    b_pad = _round_up(B, tm)

    x_pad = jnp.zeros((b_pad, dmax), jnp.float32).at[:B, :din].set(
        x.astype(jnp.float32))

    kernel = functools.partial(_mlp_fused_kernel, num_linear=L,
                               dout_pad=dout_pad)

    out_pad = pl.pallas_call(
        kernel,
        out_shape=jax.ShapeDtypeStruct((b_pad, dout_pad), jnp.float32),
        grid_spec=pltpu.PrefetchScalarGridSpec(
            num_scalar_prefetch=0,
            # Batch tiles (parallel, megacore-shardable) x layers (sequential).
            grid=(b_pad // tm, L),
            in_specs=[
                # Input tile: constant over the layer axis -> DMA'd once per
                # batch tile, stays resident.
                pl.BlockSpec((tm, dmax), lambda i, l: (i, 0)),
                # Per-layer bf16 weight / f32 bias (layer dim squeezed away).
                pl.BlockSpec((None, dmax, dmax), lambda i, l: (l, 0, 0)),
                pl.BlockSpec((None, 1, dmax), lambda i, l: (l, 0, 0)),
            ],
            # Output tile revisited across the layer axis; written at l==last,
            # flushed to HBM when the batch tile advances.
            out_specs=pl.BlockSpec((tm, dout_pad), lambda i, l: (i, 0)),
            scratch_shapes=[pltpu.VMEM((tm, dmax), jnp.float32)],
        ),
        compiler_params=pltpu.CompilerParams(
            dimension_semantics=("parallel", "arbitrary"),
            vmem_limit_bytes=vmem_budget,
        ),
    )(x_pad, ws, bs)

    # Strip batch / feature padding.
    return out_pad[:B, :dout_true]


def init_mlp_params(key, input_dim, output_dim, hidden_dim, num_layers):
    """Deterministic init matching the layer shapes of the PyTorch MLP."""
    if num_layers == 0:
        dims = [(input_dim, output_dim)]
    else:
        dims = [(input_dim, hidden_dim)]
        for _ in range(num_layers - 1):
            dims.append((hidden_dim, hidden_dim))
        dims.append((hidden_dim, output_dim))

    params = []
    for (din, dout) in dims:
        key, kw, kb = jax.random.split(key, 3)
        bound = 1.0 / jnp.sqrt(jnp.float32(din))
        w = jax.random.uniform(kw, (din, dout), jnp.float32, -bound, bound)
        b = jax.random.uniform(kb, (dout,), jnp.float32, -bound, bound)
        params.append((w, b))
    return params


def _ref_forward_f32(params, x):
    h = x.astype(jnp.float32)
    for i, (w, b) in enumerate(params):
        h = h @ w + b
        if i != len(params) - 1:
            h = jnp.maximum(h, 0.0)
    return h


def _ref_forward_mixed(params, x):
    """Matches the kernel's precision: bf16 matmul operands, f32 accumulation."""
    h = x.astype(jnp.float32)
    for i, (w, b) in enumerate(params):
        h = jnp.dot(h.astype(jnp.bfloat16), w.astype(jnp.bfloat16),
                    preferred_element_type=jnp.float32) + b.astype(jnp.float32)
        if i != len(params) - 1:
            h = jnp.maximum(h, 0.0)
    return h


if __name__ == "__main__":
    # Small shapes consistent with the module: x is [batch, input_dim].
    batch = 8
    input_dim = 32
    hidden_dim = 64
    output_dim = 16
    num_layers = 2  # Linear(32,64)+ReLU, Linear(64,64)+ReLU, Linear(64,16)

    key = jax.random.PRNGKey(0)
    key, kx = jax.random.split(key)
    x = jax.random.normal(kx, (batch, input_dim), jnp.float32)

    params = init_mlp_params(key, input_dim, output_dim, hidden_dim, num_layers)
    prepared = prepare_mlp_params(params)

    out = jax.block_until_ready(mlp_forward_fused(prepared, x))
    assert out.shape == (batch, output_dim), out.shape

    ref_mixed = _ref_forward_mixed(params, x)
    ref_f32 = _ref_forward_f32(params, x)
    assert jnp.allclose(out, ref_mixed, atol=2e-3, rtol=2e-3), (
        float(jnp.max(jnp.abs(out - ref_mixed))))
    assert jnp.allclose(out, ref_f32, atol=5e-2, rtol=5e-2), (
        float(jnp.max(jnp.abs(out - ref_f32))))

    # Also exercise the num_layers == 0 path (single Linear, no ReLU).
    params0 = init_mlp_params(key, input_dim, output_dim, hidden_dim, 0)
    prepared0 = prepare_mlp_params(params0)
    out0 = jax.block_until_ready(mlp_forward_fused(prepared0, x))
    assert out0.shape == (batch, output_dim)
    assert jnp.allclose(out0, _ref_forward_mixed(params0, x),
                        atol=2e-3, rtol=2e-3)

    print("KERNEL_OK")
</pallas_src>

<mosaic_0001>
module attributes {stable_mosaic.version = 11 : i64} {
  func.func @_mlp_fused_kernel(%arg0: i32, %arg1: i32, %arg2: memref<8x128xf32, #tpu.memory_space<vmem>>, %arg3: memref<1x128x128xbf16, #tpu.memory_space<vmem>>, %arg4: memref<1x1x128xf32, #tpu.memory_space<vmem>>, %arg5: memref<8x128xf32, #tpu.memory_space<vmem>>, %arg6: memref<8x128xf32, #tpu.memory_space<vmem>>) attributes {dimension_semantics = [#tpu.dimension_semantics<parallel>, #tpu.dimension_semantics<arbitrary>], iteration_bounds = array<i64: 1, 3>, scalar_prefetch = 0 : i64, scratch_operands = 1 : i64, tpu.core_type = #tpu.core_type<tc>, window_params = [{transform_indices = @transform_0, window_bounds = array<i64: 8, 128>}, {transform_indices = @transform_1, window_bounds = array<i64: 1, 128, 128>}, {transform_indices = @transform_2, window_bounds = array<i64: 1, 1, 128>}, {transform_indices = @transform_3, window_bounds = array<i64: 8, 128>}]} {
    %c0_i32 = arith.constant 0 : i32
    %0 = arith.cmpi eq, %arg1, %c0_i32 : i32
    %1 = arith.extui %0 : i1 to i32
    %c0_i32_0 = arith.constant 0 : i32
    %2 = arith.cmpi ne, %1, %c0_i32_0 : i32
    scf.if %2 {
      %c0_11 = arith.constant 0 : index
      %c0_12 = arith.constant 0 : index
      %18 = vector.load %arg2[%c0_11, %c0_12] : memref<8x128xf32, #tpu.memory_space<vmem>>, vector<8x128xf32>
      %c0_13 = arith.constant 0 : index
      %c0_14 = arith.constant 0 : index
      %19 = vector.load %arg6[%c0_13, %c0_14] : memref<8x128xf32, #tpu.memory_space<vmem>>, vector<8x128xf32>
      tpu.vector_store %arg6[%c0_13, %c0_14], %18 {strides = array<i32>} : memref<8x128xf32, #tpu.memory_space<vmem>>, vector<8x128xf32>,
    } else {
    }
    %c0 = arith.constant 0 : index
    %c0_1 = arith.constant 0 : index
    %3 = vector.load %arg6[%c0, %c0_1] : memref<8x128xf32, #tpu.memory_space<vmem>>, vector<8x128xf32>
    %4 = arith.truncf %3 : vector<8x128xf32> to vector<8x128xbf16>
    %c0_2 = arith.constant 0 : index
    %c0_3 = arith.constant 0 : index
    %c0_4 = arith.constant 0 : index
    %5 = vector.load %arg3[%c0_2, %c0_3, %c0_4] : memref<1x128x128xbf16, #tpu.memory_space<vmem>>, vector<1x128x128xbf16>
    %6 = vector.shape_cast %5 : vector<1x128x128xbf16> to vector<128x128xbf16>
    %cst = arith.constant dense<0.000000e+00> : vector<8x128xf32>
    %7 = tpu.matmul %4, %6, %cst {dimension_numbers = #tpu.dot_dimension_numbers<[1], [0], [0], [1], [0, 0, 1, 1], [], []>} : vector<8x128xbf16>, vector<128x128xbf16>, vector<8x128xf32> -> vector<8x128xf32>
    %c0_5 = arith.constant 0 : index
    %c0_6 = arith.constant 0 : index
    %c0_7 = arith.constant 0 : index
    %8 = vector.load %arg4[%c0_5, %c0_6, %c0_7] : memref<1x1x128xf32, #tpu.memory_space<vmem>>, vector<1x1x128xf32>
    %9 = vector.shape_cast %8 : vector<1x1x128xf32> to vector<1x128xf32>
    %10 = vector.broadcast %9 : vector<1x128xf32> to vector<8x128xf32>
    %11 = arith.addf %7, %10 : vector<8x128xf32>
    %c2_i32 = arith.constant 2 : i32
    %12 = arith.cmpi slt, %arg1, %c2_i32 : i32
    %13 = arith.extui %12 : i1 to i32
    %c0_i32_8 = arith.constant 0 : i32
    %14 = arith.cmpi ne, %13, %c0_i32_8 : i32
    scf.if %14 {
      %cst_11 = arith.constant 0.000000e+00 : f32
      %18 = vector.broadcast %cst_11 : f32 to vector<8x128xf32>
      %19 = arith.maximumf %11, %18 : vector<8x128xf32>
      %c0_12 = arith.constant 0 : index
      %c0_13 = arith.constant 0 : index
      %20 = vector.load %arg6[%c0_12, %c0_13] : memref<8x128xf32, #tpu.memory_space<vmem>>, vector<8x128xf32>
      tpu.vector_store %arg6[%c0_12, %c0_13], %19 {strides = array<i32>} : memref<8x128xf32, #tpu.memory_space<vmem>>, vector<8x128xf32>,
    } else {
    }
    %c2_i32_9 = arith.constant 2 : i32
    %15 = arith.cmpi eq, %arg1, %c2_i32_9 : i32
    %16 = arith.extui %15 : i1 to i32
    %c0_i32_10 = arith.constant 0 : i32
    %17 = arith.cmpi ne, %16, %c0_i32_10 : i32
    scf.if %17 {
      %c0_11 = arith.constant 0 : index
      %c0_12 = arith.constant 0 : index
      %18 = vector.load %arg5[%c0_11, %c0_12] : memref<8x128xf32, #tpu.memory_space<vmem>>, vector<8x128xf32>
      tpu.vector_store %arg5[%c0_11, %c0_12], %11 {strides = array<i32>} : memref<8x128xf32, #tpu.memory_space<vmem>>, vector<8x128xf32>,
    } else {
    }
    return
  }
  func.func @transform_0(%arg0: i32, %arg1: i32) -> (i32, i32) {
    %c0_i32 = arith.constant 0 : i32
    %c0_i32_0 = arith.constant 0 : i32
    return %arg0, %c0_i32 : i32, i32
  }
  func.func @transform_1(%arg0: i32, %arg1: i32) -> (i32, i32, i32) {
    %c0_i32 = arith.constant 0 : i32
    %c0_i32_0 = arith.constant 0 : i32
    %c0_i32_1 = arith.constant 0 : i32
    return %arg1, %c0_i32, %c0_i32_0 : i32, i32, i32
  }
  func.func @transform_2(%arg0: i32, %arg1: i32) -> (i32, i32, i32) {
    %c0_i32 = arith.constant 0 : i32
    %c0_i32_0 = arith.constant 0 : i32
    %c0_i32_1 = arith.constant 0 : i32
    return %arg1, %c0_i32, %c0_i32_0 : i32, i32, i32
  }
  func.func @transform_3(%arg0: i32, %arg1: i32) -> (i32, i32) {
    %c0_i32 = arith.constant 0 : i32
    %c0_i32_0 = arith.constant 0 : i32
    return %arg0, %c0_i32 : i32, i32
  }
}

</mosaic_0001>

<bundles_post_ra>
// kernel: tpu_custom_call.1
= control target key start
LH: loop header
LB: loop body
LE: loop exit
PB: predicated region body
PF: predicated region fallthrough
CT: control target
= control target key end

     0   :  { %8 = vsyncpa [#allocation4], 0  ;;  %s928_s0 = inlined_call_operand.hbm [shape: f32[8,128], index: 0, kind: input, shape index: {}]   ;;  %s929_s1 = inlined_call_operand.hbm [shape: bf16[3,128,128], index: 1, kind: input, shape index: {}]   ;;  %s930_s2 = inlined_call_operand.hbm [shape: f32[3,1,128], index: 2, kind: input, shape index: {}]   ;;  %s931_s3 = inlined_call_operand.hbm [shape: f32[8,128], index: 3, kind: output, shape index: {}]  }
   0x1   :  { %9 = vsyncpa [#allocation7], 0 }
   0x2   :  { %11 = vsyncpa [#allocation7 + $0x1], 0 }
   0x3   :  { %12 = vsyncpa [#allocation5], 0  ;;  %s793_s12 = smov 0   ;;  %s795_s13 = smov 0  }
   0x4   :  { %s797_s14 = smov 0   ;;  %s799_s15 = smov 0  }
   0x5   :  { %s801_s16 = smov 0   ;;  %s803_s17 = smov 0  }
   0x6 LB: > { %s27_s18 = sadd.s32 1, %s763_s16  ;;  %s63_s19 = sadd.s32 1, %s755_s14  ;;  %s767_s17 = sphi %s803_s17, %s18_s17   ;;  %s763_s16 = sphi %s801_s16, %s940_s16   ;;  %s759_s15 = sphi %s799_s15, %s939_s15   ;;  %s755_s14 = sphi %s797_s14, %s938_s14   ;;  %s751_s13 = sphi %s795_s13, %s937_s13   ;;  %s747_s12 = sphi %s793_s12, %s936_s12  }
   0x7   : > { %p28_p0 = scmp.ge.s32.totalorder %s27_s18, 3  ;;  %p70_p1 = scmp.ne.s32.totalorder %s755_s14, %s751_s13 }
   0x8   : > { %p71_p2 = scmp.eq.s32.totalorder %s767_s17, 0  ;;  %p534_p4 = scmp.lt.s32.totalorder %s767_s17, 3 }
   0x9   : > { %s942_s18 = smov (%p28_p0, %s27_s18), 0  ;;  %s166_s22 = sand.u32 1, %s767_s17  }
   0xa   : > { %p830_p3 = por %p71_p2, %p70_p1  ;;  %s60_s21 = ssub.s32 %s763_s16, %s942_s18 }
   0xb   : > { %p61_p5 = scmp.eq.s32.totalorder %s60_s21, 0  ;;  %s168_s23 = sand.u32 1, %s755_s14  }
   0xc   : > { %s501_s24 = sshll.u32 %s763_s16, 6  ;;  %s456_s26 = sshll.u32 %s168_s23, 6 }
   0xd   : > { %s841_s25 = scalar_select %p61_p5, %s755_s14, %s63_s19  }
   0xe   : > { %s175_s29 = scalar_lea.hbm %s929_s1, %s501_s24  ;;  %s170_s4 = scalar_lea.vmem [#allocation6], %s456_s26 }
   0xf   : > { %s176_s30 = sshll.u32 %s175_s29, 4  ;;  %s178_s5 = sshll.u32 %s170_s4, 4  ;;  %s177_s30 = int_to_ptr.hbm [resolvable:$true] %s176_s30  ;;  %s179_s5 = int_to_ptr.vmem [resolvable:$true] %s178_s5 }
  0x10   : > { %p852_p6 = pnand %p534_p4, %p830_p3  ;;  %s167_s7 = scalar_lea.sflag [#allocation7], %s166_s22 }
  0x11   : > { %s769_s8 = smov 64   ;;  %s770_s9 = smov 4  }
  0x12   : > { %529 = dma.hbm_to_vmem [thread:$0]  (!%p852_p6), %s177_s30, 1024, %s179_s5, %s167_s7, %s769_s8, %s769_s8, %s770_s9  }
  0x13   : > { %s859_s10 = sadd.s32 4294967295, %s767_s17   ;;  %p76_p7 = scmp.ne.s32.totalorder %s751_s13, %s747_s12 }
  0x14   : > { %p77_p8 = scmp.eq.s32.totalorder %s859_s10, 0  ;;  %p453_p9 = scmp.ge.s32.totalorder %s767_s17, 1 }
  0x15   : > { %p139_p10 = scmp.lt.s32.totalorder %s767_s17, 4  ;;  %s153_s22 = sshll.u32 %s928_s0, 4  ;;  %s154_s22 = int_to_ptr.hbm [resolvable:$true] %s153_s22 }
  0x16   : > { %p868_p11 = por %p77_p8, %p76_p7  ;;  %s771_s12 = smov [#allocation3]  }
  0x17   : > { %p872_p12 = pnand %p453_p9, %p139_p10  ;;  %s155_s24 = sshll.u32 %s771_s12, 4  ;;  %s156_s24 = int_to_ptr.vmem [resolvable:$true] %s155_s24 }
  0x18   : > { %s194_s28 = scalar_lea.hbm %s930_s2, %s763_s16  ;;  %s191_s30 = scalar_lea.vmem [#allocation8], %s168_s23 }
  0x19   : > { %p522_p13 = pneg %p872_p12  ;;  %s196_s29 = sshll.u32 %s194_s28, 4  ;;  %s197_s29 = int_to_ptr.hbm [resolvable:$true] %s196_s29 }
  0x1a   : > { %s198_s4 = sshll.u32 %s191_s30, 4  ;;  %207 = sbr.rel (%p872_p12) target bundleno = 228 (0xe4), region = 32  ;;  %s199_s4 = int_to_ptr.vmem [resolvable:$true] %s198_s4 }
  0x1b   : > { %p523_p0 = pnand %p522_p13, %p77_p8 }
  0x1c   : > { %532 = dma.hbm_to_vmem [thread:$0]  (!%p852_p6), %s197_s29, 16, %s199_s4, %s167_s7  }
  0x1d   : > { %525 = dma.hbm_to_vmem [thread:$0]  (!%p523_p0), %s154_s22, 128, %s156_s24, [#allocation4]  }
  0x1f   : > { %734 = dma.done.wait (%p77_p8), [#allocation4], 128  }
  0x20   : > { %736 = vsyncadd (%p77_p8), [#allocation4], 4294967168  ;;  %s214_s5 = sand.u32 1, %s859_s10   ;;  %s216_s23 = sand.u32 1, %s751_s13  }
  0x21   : > { %s461_s8 = sshll.u32 %s216_s23, 6  ;;  %s215_s9 = scalar_lea.sflag [#allocation7], %s214_s5 }
  0x22   : > { %s218_s20 = scalar_lea.vmem [#allocation6], %s461_s8 }
  0x23   : > { %738 = dma.done.wait (%p868_p11), %s215_s9, 1040  }
  0x24   : > { %740 = vsyncadd (%p868_p11), %s215_s9, 4294966256  ;;  %s227_s6 = scalar_lea.vmem [#allocation8], %s216_s23  ;;  %p462_p1 = scmp.ne.s32.totalorder %s759_s15, 0 }
  0x26   : > { %253 = sbr.rel (%p462_p1) target bundleno = 45 (0x2d), region = 48 }
  0x2b   : > { %v254_v0 = vld [vmem:[#allocation3] sm:$0xff] }
  0x2c   : > { %255 = vst [vmem:[#allocation2] sm:$0xff] %v254_v0 }
  0x2d PF: > { %v509_v1 = vld [vmem:[%s218_s20 + $0x38] sm:$0xff]  ;;  %v508_v2 = vld [vmem:[%s218_s20 + $0x30] sm:$0xff]  ;;  %v507_v3 = vld [vmem:[%s218_s20 + $0x28] sm:$0xff]  ;;  %p495_p2 = scmp.ge.s32.totalorder %s759_s15, 2 }
  0x2e   : > { %326 = vmatpush.bf16.msra.mxu0 %v509_v1  ;;  %v506_v4 = vld [vmem:[%s218_s20 + $0x20] sm:$0xff]  ;;  %v505_v5 = vld [vmem:[%s218_s20 + $0x18] sm:$0xff]  ;;  %v504_v6 = vld [vmem:[%s218_s20 + $0x10] sm:$0xff] }
  0x2f   : > { %v503_v7 = vld [vmem:[%s218_s20 + $0x8] sm:$0xff]  ;;  %v502_v8 = vld [vmem:[%s218_s20] sm:$0xff]  ;;  %v590_v11 = vld [vmem:[%s227_s6] ss:$0 sm:$0xff] }
  0x32   : > { %327 = vmatpush.bf16.msra.mxu0 %v508_v2 }
  0x33   : > { %v256_v9 = vld [vmem:[#allocation2] sm:$0xff] }
  0x34   : > { %v257_v10 = vpack.c.bf16 %v256_v9, %v256_v9 }
  0x36   : > { %328 = vmatpush.bf16.msra.mxu0 %v507_v3 }
  0x3a   : > { %329 = vmatpush.bf16.msra.mxu0 %v506_v4 }
  0x3e   : > { %330 = vmatpush.bf16.msra.mxu0 %v505_v5 }
  0x42   : > { %331 = vmatpush.bf16.msra.mxu0 %v504_v6 }
  0x46   : > { %332 = vmatpush.bf16.msra.mxu0 %v503_v7 }
  0x4a   : > { %333 = vmatpush.bf16.msra.mxu0 %v502_v8 }
  0x4d   : > { %334 = vmatmul.bf16.vlgmr.msra.gmra.mxu0 %v257_v10 }
  0xca   : > { %v335_v12 = vpop.f32.mrf.mxu0 }
  0xcb   : > { %v336_v13 = vadd.f32 %v590_v11, %v335_v12 }
  0xce   : > { %342 = sbr.rel (%p495_p2) target bundleno = 214 (0xd6), region = 52 }
  0xd2   : > { %v337_v14 = vpop.f32.mrf.mxu0 }
  0xd3   : > { %v343_v15 = vmax.f32 %v336_v13, 0.0 }
  0xd5   : > { %344 = vst [vmem:[#allocation2] sm:$0xff] %v343_v15 }
  0xd6 PF: > { %p496_p3 = scmp.ne.s32.totalorder %s759_s15, 2 }
  0xd8   : > { %348 = sbr.rel (%p496_p3) target bundleno = 222 (0xde), region = 56 }
  0xdd   : > { %349 = vst [vmem:[#allocation9] sm:$0xff] %v336_v13 }
  0xde PF: > { %p536_p4 = scmp.eq.s32.totalorder %s859_s10, 2  ;;  %s360_s19 = sshll.u32 %s931_s3, 4  ;;  %s361_s19 = int_to_ptr.hbm [resolvable:$true] %s360_s19 }
  0xdf   : > { %s772_s21 = smov [#allocation9]  }
  0xe0   : > { %s358_s22 = sshll.u32 %s772_s21, 4  ;;  %s359_s22 = int_to_ptr.vmem [resolvable:$true] %s358_s22 }
  0xe1   : > { %519 = dma.vmem_to_hbm [thread:$0]  (%p536_p4), %s359_s22, 128, %s361_s19, [#allocation5]  }
  0xe2   : > { %742 = dma.done.wait (%p536_p4), [#allocation5], 128  }
  0xe3   : > { %744 = vsyncadd (%p536_p4), [#allocation5], 4294967168 }
  0xe4 PF: > { %s18_s17 = sadd.s32 1, %s767_s17   ;;  %s936_s12 = smov %s751_s13 }
  0xe5   : > { %p15_p5 = scmp.ge.s32.totalorder %s18_s17, 5   ;;  %s937_s13 = smov %s755_s14 }
  0xe6   : > { %s938_s14 = smov %s841_s25  ;;  %s939_s15 = smov %s763_s16 }
  0xe7   : > { %s940_s16 = smov %s942_s18  ;;  %17 = sbr.rel (!%p15_p5) target bundleno = 6 (0x6), region = 99 }
  0xec   :  { %374 = vsyncpa [#allocation4], 1 }
  0xed   :  { %376 = vsyncpa [#allocation4 + $0x1], 1 }
  0xee   :  { %377 = vsyncpa [#allocation7], 1 }
  0xef   :  { %379 = vsyncpa [#allocation7 + $0x1], 1 }
  0xf0   :  { %380 = vsyncpa [#allocation5], 1 }
  0xf1   :  { %382 = vsyncpa [#allocation5 + $0x1], 1 }

</bundles_post_ra>
